<compile_context>
chip_gen: v7x
topology: tpu7x:2x2x1
jax: 0.10.0
libtpu: 0.0.40
codegen_flags: <defaults>
</compile_context>

<pallas_src>
import functools

import jax
import jax.numpy as jnp
from jax.experimental import pallas as pl
from jax.experimental.pallas import tpu as pltpu

# ----------------------------- model constants -----------------------------
DIM = 128           # module's `dim` (reduced from 1500 for the small test)
LSTM_HIDDEN = 128   # module's `lstm_hidden`
LAYER_NUM = 1       # module hard-codes layer_num = 1
PADDED_CLASSES = 128  # lane-dense padded classifier width

_VMEM = pl.BlockSpec(memory_space=pltpu.MemorySpace.VMEM)
_NEG_INF = jnp.float32(-1e30)


# ------------------------------ fused kernel --------------------------------
def _geniepath_fused_kernel(x_ref, w1_ref, b1_ref,
                            gw_ref, asrc_ref, adst_ref, gbias_ref,
                            maskb_ref, wih_ref, w2_ref, b2_ref,
                            o_ref):
    # ---- lin1: x1 = X @ W1 + b1 -------------------------------------- (N,D)
    x1 = (jnp.dot(x_ref[...], w1_ref[...], preferred_element_type=jnp.float32)
          + b1_ref[...])

    # ---- Breadth: GATConv(heads=1) + tanh -----------------------------------
    # projection (PyG GATConv's internal linear has no bias)
    xp = jnp.dot(x1, gw_ref[...], preferred_element_type=jnp.float32)   # (N,D)
    a_src = jnp.sum(xp * asrc_ref[...], axis=1, keepdims=True)          # (N,1)
    a_dst = jnp.sum(xp * adst_ref[...], axis=1, keepdims=True)          # (N,1)
    # logits[i, j] = leaky_relu(a_dst[i] + a_src[j], 0.2) for edge j -> i
    logits = a_dst + a_src.T                                            # (N,N)
    logits = jnp.where(logits > 0, logits, 0.2 * logits) + maskb_ref[...]
    m = jnp.max(logits, axis=1, keepdims=True)
    e = jnp.exp(logits - m)
    p = e * pl.reciprocal(jnp.sum(e, axis=1, keepdims=True), approx=True)
    xb = jnp.tanh(jnp.dot(p, xp, preferred_element_type=jnp.float32)
                  + gbias_ref[...])                                     # (N,D)

    # ---- Depth: one LSTM step, no bias, h = c = 0 (layer_num == 1) ----------
    # gates = xb @ Wih^T (+ h @ Whh^T == 0); PyTorch gate order (i, f, g, o)
    gates = jnp.dot(xb, wih_ref[...], preferred_element_type=jnp.float32)
    H = LSTM_HIDDEN
    i_g = jax.nn.sigmoid(gates[:, 0 * H:1 * H])
    g_g = jnp.tanh(gates[:, 2 * H:3 * H])
    o_g = jax.nn.sigmoid(gates[:, 3 * H:4 * H])
    c_new = i_g * g_g                       # f*c term vanishes (c == 0)
    h_new = o_g * jnp.tanh(c_new)

    # ---- lin2 + log_softmax (lane-dense, 128 padded classes) ----------------
    # padded weight columns are 0, padded bias entries are -1e30, so the
    # row-wise max / sum-exp are exact for the real classes.
    y = (jnp.dot(h_new, w2_ref[...], preferred_element_type=jnp.float32)
         + b2_ref[...])
    my = jnp.max(y, axis=1, keepdims=True)
    z = y - my
    lse = jnp.log(jnp.sum(jnp.exp(z), axis=1, keepdims=True))
    o_ref[...] = z - lse


# ------------------------------ forward wrapper ------------------------------
@functools.partial(jax.jit, static_argnames=("out_dim",))
def geniepath_forward(params, x, mask_bias, out_dim):
    n = x.shape[0]
    out_padded = pl.pallas_call(
        _geniepath_fused_kernel,
        out_shape=jax.ShapeDtypeStruct((n, PADDED_CLASSES), jnp.float32),
        in_specs=[_VMEM] * 11,
        out_specs=_VMEM,
    )(x,
      params["w1_t"], params["b1"],
      params["gat_w_t"], params["att_src"], params["att_dst"], params["gat_bias"],
      mask_bias,
      params["w_ih_t"],
      params["w2p_t"], params["b2p"])
    return out_padded[:, :out_dim]


# ------------------------------ param / graph setup --------------------------
def make_params(key, in_dim, out_dim):
    ks = jax.random.split(key, 16)
    s = 0.05
    lk = jax.random.split(ks[4], 6)

    # classifier weights padded to a lane-dense 128-wide output:
    w2 = s * jax.random.normal(ks[2], (DIM, out_dim), jnp.float32)
    b2 = s * jax.random.normal(ks[3], (out_dim,), jnp.float32)
    w2p = jnp.zeros((DIM, PADDED_CLASSES), jnp.float32).at[:, :out_dim].set(w2)
    b2p = jnp.full((1, PADDED_CLASSES), _NEG_INF, jnp.float32).at[0, :out_dim].set(b2)

    params = {
        "w1_t": s * jax.random.normal(ks[0], (in_dim, DIM), jnp.float32),
        "b1":   (s * jax.random.normal(ks[1], (DIM,), jnp.float32)).reshape(1, -1),
        "w2p_t": w2p,
        "b2p":   b2p,
        # GAT layer (single layer, heads=1)
        "gat_w_t":  s * jax.random.normal(lk[0], (DIM, DIM), jnp.float32),
        "att_src":  (s * jax.random.normal(lk[1], (DIM,), jnp.float32)).reshape(1, -1),
        "att_dst":  (s * jax.random.normal(lk[2], (DIM,), jnp.float32)).reshape(1, -1),
        "gat_bias": (s * jax.random.normal(lk[3], (DIM,), jnp.float32)).reshape(1, -1),
        # LSTM input-to-hidden weights, stored transposed: (D, 4H).
        # w_hh is intentionally NOT materialized: with layer_num == 1 the
        # hidden state is zero at the only step, so h @ Whh == 0 exactly.
        "w_ih_t": s * jax.random.normal(lk[4], (DIM, 4 * LSTM_HIDDEN), jnp.float32),
    }
    return params


def build_adj_mask_bias(edge_index, num_nodes):
    """Additive attention mask: 0 where edge j -> i exists (plus self loops),
    -1e30 elsewhere.  Matches PyG GATConv add_self_loops=True,
    flow='source_to_target'.  Requires a duplicate-free edge list (the dense
    masked softmax is only equivalent to the segment softmax in that case)."""
    src = [int(v) for v in edge_index[0]]
    dst = [int(v) for v in edge_index[1]]
    pairs = list(zip(src, dst))
    assert len(pairs) == len(set(pairs)), "duplicate edges break dense softmax"
    mask = jnp.zeros((num_nodes, num_nodes), jnp.float32)
    mask = mask.at[jnp.asarray(dst), jnp.asarray(src)].set(1.0)
    mask = jnp.minimum(mask + jnp.eye(num_nodes, dtype=jnp.float32), 1.0)
    return jnp.where(mask > 0, jnp.float32(0.0), _NEG_INF)


# ------------------------------ pure-JAX reference ---------------------------
def reference_forward(params, x, mask_bias, out_dim):
    x1 = x @ params["w1_t"] + params["b1"]
    xp = x1 @ params["gat_w_t"]
    a_src = jnp.sum(xp * params["att_src"], axis=1, keepdims=True)
    a_dst = jnp.sum(xp * params["att_dst"], axis=1, keepdims=True)
    logits = a_dst + a_src.T
    logits = jnp.where(logits > 0, logits, 0.2 * logits) + mask_bias
    p = jax.nn.softmax(logits, axis=1)
    xb = jnp.tanh(p @ xp + params["gat_bias"])
    gates = xb @ params["w_ih_t"]
    H = LSTM_HIDDEN
    i_g = jax.nn.sigmoid(gates[:, :H])
    g_g = jnp.tanh(gates[:, 2 * H:3 * H])
    o_g = jax.nn.sigmoid(gates[:, 3 * H:])
    h_new = o_g * jnp.tanh(i_g * g_g)
    y = h_new @ params["w2p_t"][:, :out_dim] + params["b2p"][0, :out_dim]
    return jax.nn.log_softmax(y, axis=1)


# ----------------------------------- main ------------------------------------
if __name__ == "__main__":
    key = jax.random.PRNGKey(0)
    k_feat, k_param = jax.random.split(key)

    num_nodes = 8
    in_dim = 16
    out_dim = 7  # Cora-like number of classes

    # node features
    x = jax.random.normal(k_feat, (num_nodes, in_dim), jnp.float32)

    # small deterministic directed graph (ring + a few chords), no duplicates
    src = jnp.array([0, 1, 2, 3, 4, 5, 6, 7, 0, 2, 4, 6], dtype=jnp.int32)
    dst = jnp.array([1, 2, 3, 4, 5, 6, 7, 0, 4, 6, 0, 2], dtype=jnp.int32)
    edge_index = jnp.stack([src, dst], axis=0)
    mask_bias = build_adj_mask_bias(edge_index, num_nodes)

    params = make_params(k_param, in_dim, out_dim)

    out = geniepath_forward(params, x, mask_bias, out_dim)
    out = jax.block_until_ready(out)

    assert out.shape == (num_nodes, out_dim)
    # rows of log_softmax should sum (after exp) to 1
    row_sums = jnp.exp(out).sum(axis=1)
    assert bool(jnp.all(jnp.abs(row_sums - 1.0) < 1e-4))

    # correctness vs. a pure-JAX reference (tolerance covers approx reciprocal)
    ref = reference_forward(params, x, mask_bias, out_dim)
    assert bool(jnp.allclose(out, ref, atol=1e-2, rtol=1e-2))

    print("KERNEL_OK")
</pallas_src>

<mosaic_0001>
module attributes {stable_mosaic.version = 11 : i64} {
  func.func @_geniepath_fused_kernel(%arg0: memref<8x16xf32, #tpu.memory_space<vmem>>, %arg1: memref<16x128xf32, #tpu.memory_space<vmem>>, %arg2: memref<1x128xf32, #tpu.memory_space<vmem>>, %arg3: memref<128x128xf32, #tpu.memory_space<vmem>>, %arg4: memref<1x128xf32, #tpu.memory_space<vmem>>, %arg5: memref<1x128xf32, #tpu.memory_space<vmem>>, %arg6: memref<1x128xf32, #tpu.memory_space<vmem>>, %arg7: memref<8x8xf32, #tpu.memory_space<vmem>>, %arg8: memref<128x512xf32, #tpu.memory_space<vmem>>, %arg9: memref<128x128xf32, #tpu.memory_space<vmem>>, %arg10: memref<1x128xf32, #tpu.memory_space<vmem>>, %arg11: memref<8x128xf32, #tpu.memory_space<vmem>>) attributes {dimension_semantics = [], scalar_prefetch = 0 : i64, scratch_operands = 0 : i64, tpu.core_type = #tpu.core_type<tc>} {
    %c0 = arith.constant 0 : index
    %c0_0 = arith.constant 0 : index
    %0 = vector.load %arg0[%c0, %c0_0] : memref<8x16xf32, #tpu.memory_space<vmem>>, vector<8x16xf32>
    %c0_1 = arith.constant 0 : index
    %c0_2 = arith.constant 0 : index
    %1 = vector.load %arg1[%c0_1, %c0_2] : memref<16x128xf32, #tpu.memory_space<vmem>>, vector<16x128xf32>
    %cst = arith.constant dense<0.000000e+00> : vector<8x128xf32>
    %2 = tpu.matmul %0, %1, %cst {dimension_numbers = #tpu.dot_dimension_numbers<[1], [0], [0], [1], [0, 0, 1, 1], [], []>} : vector<8x16xf32>, vector<16x128xf32>, vector<8x128xf32> -> vector<8x128xf32>
    %c0_3 = arith.constant 0 : index
    %c0_4 = arith.constant 0 : index
    %3 = vector.load %arg2[%c0_3, %c0_4] : memref<1x128xf32, #tpu.memory_space<vmem>>, vector<1x128xf32>
    %4 = vector.broadcast %3 : vector<1x128xf32> to vector<8x128xf32>
    %5 = arith.addf %2, %4 : vector<8x128xf32>
    %c0_5 = arith.constant 0 : index
    %c0_6 = arith.constant 0 : index
    %6 = vector.load %arg3[%c0_5, %c0_6] : memref<128x128xf32, #tpu.memory_space<vmem>>, vector<128x128xf32>
    %cst_7 = arith.constant dense<0.000000e+00> : vector<8x128xf32>
    %7 = tpu.matmul %5, %6, %cst_7 {dimension_numbers = #tpu.dot_dimension_numbers<[1], [0], [0], [1], [0, 0, 1, 1], [], []>} : vector<8x128xf32>, vector<128x128xf32>, vector<8x128xf32> -> vector<8x128xf32>
    %c0_8 = arith.constant 0 : index
    %c0_9 = arith.constant 0 : index
    %8 = vector.load %arg4[%c0_8, %c0_9] : memref<1x128xf32, #tpu.memory_space<vmem>>, vector<1x128xf32>
    %9 = vector.broadcast %8 : vector<1x128xf32> to vector<8x128xf32>
    %10 = arith.mulf %7, %9 : vector<8x128xf32>
    %cst_10 = arith.constant dense<0.000000e+00> : vector<8xf32>
    %11 = vector.multi_reduction <add>, %10, %cst_10 [1] : vector<8x128xf32> to vector<8xf32>
    %12 = vector.shape_cast %11 : vector<8xf32> to vector<8x1xf32>
    %c0_11 = arith.constant 0 : index
    %c0_12 = arith.constant 0 : index
    %13 = vector.load %arg5[%c0_11, %c0_12] : memref<1x128xf32, #tpu.memory_space<vmem>>, vector<1x128xf32>
    %14 = vector.broadcast %13 : vector<1x128xf32> to vector<8x128xf32>
    %15 = arith.mulf %7, %14 : vector<8x128xf32>
    %cst_13 = arith.constant dense<0.000000e+00> : vector<8xf32>
    %16 = vector.multi_reduction <add>, %15, %cst_13 [1] : vector<8x128xf32> to vector<8xf32>
    %17 = vector.shape_cast %16 : vector<8xf32> to vector<8x1xf32>
    %18 = tpu.transpose %12, [1, 0] : vector<8x1xf32> -> vector<1x8xf32>
    %19 = vector.broadcast %17 : vector<8x1xf32> to vector<8x8xf32>
    %20 = vector.broadcast %18 : vector<1x8xf32> to vector<8x8xf32>
    %21 = arith.addf %19, %20 : vector<8x8xf32>
    %cst_14 = arith.constant 0.000000e+00 : f32
    %22 = vector.broadcast %cst_14 : f32 to vector<8x8xf32>
    %23 = arith.cmpf ogt, %21, %22 : vector<8x8xf32>
    %cst_15 = arith.constant 2.000000e-01 : f32
    %24 = vector.broadcast %cst_15 : f32 to vector<8x8xf32>
    %25 = arith.mulf %24, %21 : vector<8x8xf32>
    %26 = arith.select %23, %21, %25 : vector<8x8xi1>, vector<8x8xf32>
    %c0_16 = arith.constant 0 : index
    %c0_17 = arith.constant 0 : index
    %27 = vector.load %arg7[%c0_16, %c0_17] : memref<8x8xf32, #tpu.memory_space<vmem>>, vector<8x8xf32>
    %28 = arith.addf %26, %27 : vector<8x8xf32>
    %cst_18 = arith.constant dense<0xFF800000> : vector<8xf32>
    %29 = vector.multi_reduction <maximumf>, %28, %cst_18 [1] : vector<8x8xf32> to vector<8xf32>
    %30 = vector.shape_cast %29 : vector<8xf32> to vector<8x1xf32>
    %31 = vector.broadcast %30 : vector<8x1xf32> to vector<8x8xf32>
    %32 = arith.subf %28, %31 : vector<8x8xf32>
    %33 = math.exp %32 : vector<8x8xf32>
    %cst_19 = arith.constant dense<0.000000e+00> : vector<8xf32>
    %34 = vector.multi_reduction <add>, %33, %cst_19 [1] : vector<8x8xf32> to vector<8xf32>
    %35 = vector.shape_cast %34 : vector<8xf32> to vector<8x1xf32>
    %36 = tpu.reciprocal %35 {approx = true} : vector<8x1xf32> -> vector<8x1xf32>
    %37 = vector.broadcast %36 : vector<8x1xf32> to vector<8x8xf32>
    %38 = arith.mulf %33, %37 : vector<8x8xf32>
    %cst_20 = arith.constant dense<0.000000e+00> : vector<8x128xf32>
    %39 = tpu.matmul %38, %7, %cst_20 {dimension_numbers = #tpu.dot_dimension_numbers<[1], [0], [0], [1], [0, 0, 1, 1], [], []>} : vector<8x8xf32>, vector<8x128xf32>, vector<8x128xf32> -> vector<8x128xf32>
    %c0_21 = arith.constant 0 : index
    %c0_22 = arith.constant 0 : index
    %40 = vector.load %arg6[%c0_21, %c0_22] : memref<1x128xf32, #tpu.memory_space<vmem>>, vector<1x128xf32>
    %41 = vector.broadcast %40 : vector<1x128xf32> to vector<8x128xf32>
    %42 = arith.addf %39, %41 : vector<8x128xf32>
    %43 = math.tanh %42 : vector<8x128xf32>
    %c0_23 = arith.constant 0 : index
    %c0_24 = arith.constant 0 : index
    %44 = vector.load %arg8[%c0_23, %c0_24] : memref<128x512xf32, #tpu.memory_space<vmem>>, vector<128x512xf32>
    %cst_25 = arith.constant dense<0.000000e+00> : vector<8x512xf32>
    %45 = tpu.matmul %43, %44, %cst_25 {dimension_numbers = #tpu.dot_dimension_numbers<[1], [0], [0], [1], [0, 0, 1, 1], [], []>} : vector<8x128xf32>, vector<128x512xf32>, vector<8x512xf32> -> vector<8x512xf32>
    %46 = vector.extract_strided_slice %45 {offsets = [0, 0], sizes = [8, 128], strides = [1, 1]} : vector<8x512xf32> to vector<8x128xf32>
    %47 = arith.negf %46 : vector<8x128xf32>
    %48 = math.exp %47 : vector<8x128xf32>
    %cst_26 = arith.constant 1.000000e+00 : f32
    %49 = vector.broadcast %cst_26 : f32 to vector<8x128xf32>
    %50 = arith.addf %49, %48 : vector<8x128xf32>
    %51 = arith.divf %49, %50 : vector<8x128xf32>
    %52 = vector.extract_strided_slice %45 {offsets = [0, 256], sizes = [8, 128], strides = [1, 1]} : vector<8x512xf32> to vector<8x128xf32>
    %53 = math.tanh %52 : vector<8x128xf32>
    %54 = vector.extract_strided_slice %45 {offsets = [0, 384], sizes = [8, 128], strides = [1, 1]} : vector<8x512xf32> to vector<8x128xf32>
    %55 = arith.negf %54 : vector<8x128xf32>
    %56 = math.exp %55 : vector<8x128xf32>
    %cst_27 = arith.constant 1.000000e+00 : f32
    %57 = vector.broadcast %cst_27 : f32 to vector<8x128xf32>
    %58 = arith.addf %57, %56 : vector<8x128xf32>
    %59 = arith.divf %57, %58 : vector<8x128xf32>
    %60 = arith.mulf %51, %53 : vector<8x128xf32>
    %61 = math.tanh %60 : vector<8x128xf32>
    %62 = arith.mulf %59, %61 : vector<8x128xf32>
    %c0_28 = arith.constant 0 : index
    %c0_29 = arith.constant 0 : index
    %63 = vector.load %arg9[%c0_28, %c0_29] : memref<128x128xf32, #tpu.memory_space<vmem>>, vector<128x128xf32>
    %cst_30 = arith.constant dense<0.000000e+00> : vector<8x128xf32>
    %64 = tpu.matmul %62, %63, %cst_30 {dimension_numbers = #tpu.dot_dimension_numbers<[1], [0], [0], [1], [0, 0, 1, 1], [], []>} : vector<8x128xf32>, vector<128x128xf32>, vector<8x128xf32> -> vector<8x128xf32>
    %c0_31 = arith.constant 0 : index
    %c0_32 = arith.constant 0 : index
    %65 = vector.load %arg10[%c0_31, %c0_32] : memref<1x128xf32, #tpu.memory_space<vmem>>, vector<1x128xf32>
    %66 = vector.broadcast %65 : vector<1x128xf32> to vector<8x128xf32>
    %67 = arith.addf %64, %66 : vector<8x128xf32>
    %cst_33 = arith.constant dense<0xFF800000> : vector<8xf32>
    %68 = vector.multi_reduction <maximumf>, %67, %cst_33 [1] : vector<8x128xf32> to vector<8xf32>
    %69 = vector.shape_cast %68 : vector<8xf32> to vector<8x1xf32>
    %70 = vector.broadcast %69 : vector<8x1xf32> to vector<8x128xf32>
    %71 = arith.subf %67, %70 : vector<8x128xf32>
    %72 = math.exp %71 : vector<8x128xf32>
    %cst_34 = arith.constant dense<0.000000e+00> : vector<8xf32>
    %73 = vector.multi_reduction <add>, %72, %cst_34 [1] : vector<8x128xf32> to vector<8xf32>
    %74 = vector.shape_cast %73 : vector<8xf32> to vector<8x1xf32>
    %75 = math.log %74 : vector<8x1xf32>
    %76 = vector.broadcast %75 : vector<8x1xf32> to vector<8x128xf32>
    %77 = arith.subf %71, %76 : vector<8x128xf32>
    %c0_35 = arith.constant 0 : index
    %c0_36 = arith.constant 0 : index
    %78 = vector.load %arg11[%c0_35, %c0_36] : memref<8x128xf32, #tpu.memory_space<vmem>>, vector<8x128xf32>
    tpu.vector_store %arg11[%c0_35, %c0_36], %77 {strides = array<i32>} : memref<8x128xf32, #tpu.memory_space<vmem>>, vector<8x128xf32>,
    return
  }
}

</mosaic_0001>

<bundles_post_ra>
// kernel: geniepath_forward.1
= control target key start
LH: loop header
LB: loop body
LE: loop exit
PB: predicated region body
PF: predicated region fallthrough
CT: control target
= control target key end

     0   :  { %16 = vsyncpa [#allocation3], 0  ;;  %s1448_s0 = inlined_call_operand.vmem [shape: f32[8,16], index: 0, kind: input, shape index: {}]   ;;  %s1449_s1 = inlined_call_operand.vmem [shape: f32[16,128], index: 1, kind: input, shape index: {}]   ;;  %s1450_s2 = inlined_call_operand.vmem [shape: f32[1,128], index: 2, kind: input, shape index: {}]   ;;  %s1451_s3 = inlined_call_operand.hbm [shape: f32[128,128], index: 3, kind: input, shape index: {}]   ;;  %s1452_s4 = inlined_call_operand.vmem [shape: f32[1,128], index: 4, kind: input, shape index: {}]   ;;  %s1453_s5 = inlined_call_operand.hbm [shape: f32[1,128], index: 5, kind: input, shape index: {}]   ;;  %s1454_s6 = inlined_call_operand.hbm [shape: f32[1,128], index: 6, kind: input, shape index: {}]   ;;  %s1455_s7 = inlined_call_operand.vmem [shape: f32[8,8], index: 7, kind: input, shape index: {}]   ;;  %s1456_s8 = inlined_call_operand.hbm [shape: f32[128,512], index: 8, kind: input, shape index: {}]   ;;  %s1457_s9 = inlined_call_operand.hbm [shape: f32[128,128], index: 9, kind: input, shape index: {}]   ;;  %s1458_s10 = inlined_call_operand.hbm [shape: f32[1,128], index: 10, kind: input, shape index: {}]   ;;  %s1459_s11 = inlined_call_operand.hbm [shape: f32[8,128], index: 11, kind: output, shape index: {}]  }
   0x1   :  { %17 = vsyncpa [#allocation6], 0 }
   0x2   :  { %18 = vsyncpa [#allocation9], 0 }
   0x3   :  { %19 = vsyncpa [#allocation12], 0 }
   0x4   :  { %20 = vsyncpa [#allocation4], 0  ;;  %s1228_s17 = smov [#allocation5]   ;;  %s1229_s19 = smov [#allocation8]  }
   0x5   :  { %s47_s18 = sshll.u32 %s1228_s17, 4  ;;  %s68_s20 = sshll.u32 %s1229_s19, 4  ;;  %s48_s18 = int_to_ptr.vmem [resolvable:$true] %s47_s18  ;;  %s1302_s20 = int_to_ptr.vmem [resolvable:$true] %s68_s20 }
   0x6   :  { %s1064_s23 = scalar_lea.hbm %s1453_s5, 16 }
   0x7   :  { %p1065_p0 = scmp.ne.s32.totalorder %s1453_s5, %s1064_s23  ;;  %p1068_p1 = scmp.lt.u32.totalorder %s1064_s23, %s1453_s5 }
   0x9   :  { %p1070_p2 = pnand %p1068_p1, %p1065_p0 }
   0xb   :  { %1073 = shalt.err (!%p1070_p2)
}
   0xc   :  { %s1074_s28 = scalar_lea.vmem %s48_s18, 16  ;;  %s1078_s29 = scalar_lea.vmem %s48_s18, 32 }
   0xd   :  { %p1075_p3 = scmp.ne.s32.totalorder %s48_s18, %s1074_s28  ;;  %p1079_p4 = scmp.lt.s32.totalorder %s48_s18, %s48_s18 }
   0xe   :  { %p1080_p5 = scmp.lt.s32.totalorder %s1078_s29, %s1074_s28 }
  0x10   :  { %p1081_p6 = por %p1080_p5, %p1079_p4 }
  0x12   :  { %p1082_p7 = pnand %p1081_p6, %p1075_p3 }
  0x14   :  { %1085 = shalt.err (!%p1082_p7)
}
  0x15   :  { %50 = dma.hbm_to_vmem [thread:$0]  %s1453_s5, 16, %s48_s18, [#allocation6]  }
  0x16   :  { %s1086_s15 = scalar_lea.hbm %s1456_s8, 8192 }
  0x17   :  { %p1087_p8 = scmp.ne.s32.totalorder %s1456_s8, %s1086_s15  ;;  %p1090_p9 = scmp.lt.u32.totalorder %s1086_s15, %s1456_s8 }
  0x19   :  { %p1092_p10 = pnand %p1090_p9, %p1087_p8 }
  0x1b   :  { %1095 = shalt.err (!%p1092_p10)
}
  0x1c   :  { %s1096_s22 = scalar_lea.vmem %s1302_s20, 8192  ;;  %p1101_p12 = scmp.lt.s32.totalorder %s1302_s20, %s1302_s20 }
  0x1d   :  { %p1097_p11 = scmp.ne.s32.totalorder %s1302_s20, %s1096_s22  ;;  %p1102_p13 = scmp.lt.s32.totalorder %s1096_s22, %s1096_s22 }
  0x1f   :  { %p1103_p0 = por %p1102_p13, %p1101_p12 }
  0x21   :  { %p1104_p1 = pnand %p1103_p0, %p1097_p11 }
  0x23   :  { %1107 = shalt.err (!%p1104_p1)
}
  0x24   :  { %s1230_s5 = smov 512   ;;  %s1231_s18 = smov 32  }
  0x25   :  { %74 = dma.hbm_to_vmem [thread:$0]  %s1456_s8, 8192, %s1302_s20, [#allocation9], %s1230_s5, %s1230_s5, %s1231_s18  }
  0x26   :  { %s1232_s25 = smov [#allocation2]   ;;  %s1108_s29 = scalar_lea.hbm %s1451_s3, 2048 }
  0x27   :  { %s32_s26 = sshll.u32 %s1232_s25, 4  ;;  %p1109_p2 = scmp.ne.s32.totalorder %s1451_s3, %s1108_s29  ;;  %s33_s26 = int_to_ptr.vmem [resolvable:$true] %s32_s26 }
  0x28   :  { %p1112_p3 = scmp.lt.u32.totalorder %s1108_s29, %s1451_s3 }
  0x2a   :  { %p1114_p4 = pnand %p1112_p3, %p1109_p2 }
  0x2c   :  { %1117 = shalt.err (!%p1114_p4)
}
  0x2d   :  { %s1118_s15 = scalar_lea.vmem %s33_s26, 2048  ;;  %p1123_p6 = scmp.lt.s32.totalorder %s33_s26, %s33_s26 }
  0x2e   :  { %p1119_p5 = scmp.ne.s32.totalorder %s33_s26, %s1118_s15  ;;  %p1124_p7 = scmp.lt.s32.totalorder %s1118_s15, %s1118_s15 }
  0x30   :  { %p1125_p8 = por %p1124_p7, %p1123_p6 }
  0x32   :  { %p1126_p9 = pnand %p1125_p8, %p1119_p5 }
  0x34   :  { %1129 = shalt.err (!%p1126_p9)
}
  0x35   :  { %s1233_s8 = smov 128   ;;  %s1234_s20 = smov 8  }
  0x36   :  { %38 = dma.hbm_to_vmem [thread:$0]  %s1451_s3, 2048, %s33_s26, [#allocation3], %s1233_s8, %s1233_s8, %s1234_s20  }
  0x37   :  { %s1235_s19 = smov [#allocation7]   ;;  %s1236_s22 = smov [#allocation10]  }
  0x38   :  { %s57_s21 = sshll.u32 %s1235_s19, 4  ;;  %s80_s5 = sshll.u32 %s1236_s22, 4  ;;  %s58_s21 = int_to_ptr.vmem [resolvable:$true] %s57_s21  ;;  %s81_s5 = int_to_ptr.vmem [resolvable:$true] %s80_s5 }
  0x39   :  { %s1130_s24 = scalar_lea.hbm %s1454_s6, 16 }
  0x3a   :  { %p1131_p10 = scmp.ne.s32.totalorder %s1454_s6, %s1130_s24  ;;  %p1134_p11 = scmp.lt.u32.totalorder %s1130_s24, %s1454_s6 }
  0x3c   :  { %p1136_p12 = pnand %p1134_p11, %p1131_p10 }
  0x3e   :  { %1139 = shalt.err (!%p1136_p12)
}
  0x3f   :  { %s1140_s3 = scalar_lea.vmem %s58_s21, 16  ;;  %s1144_s26 = scalar_lea.vmem %s58_s21, 32 }
  0x40   :  { %p1141_p13 = scmp.ne.s32.totalorder %s58_s21, %s1140_s3  ;;  %p1145_p0 = scmp.lt.s32.totalorder %s58_s21, %s58_s21 }
  0x41   :  { %p1146_p1 = scmp.lt.s32.totalorder %s1144_s26, %s1140_s3 }
  0x43   :  { %p1147_p2 = por %p1146_p1, %p1145_p0 }
  0x45   :  { %p1148_p3 = pnand %p1147_p2, %p1141_p13 }
  0x47   :  { %1151 = shalt.err (!%p1148_p3)
}
  0x48   :  { %60 = dma.hbm_to_vmem [thread:$0]  %s1454_s6, 16, %s58_s21, [#allocation6]  }
  0x49   :  { %s1152_s15 = scalar_lea.hbm %s1457_s9, 2048 }
  0x4a   :  { %p1153_p4 = scmp.ne.s32.totalorder %s1457_s9, %s1152_s15  ;;  %p1156_p5 = scmp.lt.u32.totalorder %s1152_s15, %s1457_s9 }
  0x4c   :  { %p1158_p6 = pnand %p1156_p5, %p1153_p4 }
  0x4e   :  { %1161 = shalt.err (!%p1158_p6)
}
  0x4f   :  { %s1162_s18 = scalar_lea.vmem %s81_s5, 2048  ;;  %p1167_p8 = scmp.lt.s32.totalorder %s81_s5, %s81_s5 }
  0x50   :  { %p1163_p7 = scmp.ne.s32.totalorder %s81_s5, %s1162_s18  ;;  %p1168_p9 = scmp.lt.s32.totalorder %s1162_s18, %s1162_s18 }
  0x52   :  { %p1169_p10 = por %p1168_p9, %p1167_p8 }
  0x54   :  { %p1170_p11 = pnand %p1169_p10, %p1163_p7 }
  0x56   :  { %1173 = shalt.err (!%p1170_p11)
}
  0x57   :  { %86 = dma.hbm_to_vmem [thread:$0]  %s1457_s9, 2048, %s81_s5, [#allocation9], %s1233_s8, %s1233_s8, %s1234_s20  }
  0x58   :  { %s1237_s23 = smov [#allocation11]   ;;  %s1174_s28 = scalar_lea.hbm %s1458_s10, 16 }
  0x59   :  { %s93_s24 = sshll.u32 %s1237_s23, 4  ;;  %p1175_p12 = scmp.ne.s32.totalorder %s1458_s10, %s1174_s28  ;;  %s94_s24 = int_to_ptr.vmem [resolvable:$true] %s93_s24 }
  0x5a   :  { %p1178_p13 = scmp.lt.u32.totalorder %s1174_s28, %s1458_s10 }
  0x5c   :  { %p1180_p0 = pnand %p1178_p13, %p1175_p12 }
  0x5e   :  { %1183 = shalt.err (!%p1180_p0)
}
  0x5f   :  { %s1184_s12 = scalar_lea.vmem %s94_s24, 16  ;;  %s1188_s9 = scalar_lea.vmem %s94_s24, 32 }
  0x60   :  { %p1185_p1 = scmp.ne.s32.totalorder %s94_s24, %s1184_s12  ;;  %p1189_p2 = scmp.lt.s32.totalorder %s94_s24, %s94_s24 }
  0x61   :  { %p1190_p3 = scmp.lt.s32.totalorder %s1188_s9, %s1184_s12 }
  0x63   :  { %p1191_p4 = por %p1190_p3, %p1189_p2 }
  0x65   :  { %p1192_p5 = pnand %p1191_p4, %p1185_p1 }
  0x67   :  { %1195 = shalt.err (!%p1192_p5)
}
  0x68   :  { %96 = dma.hbm_to_vmem [thread:$0]  %s1458_s10, 16, %s94_s24, [#allocation12]  }
  0x69   :  { %1218 = dma.done.wait [#allocation3], 2048  }
  0x6a   :  { %1219 = vsyncadd [#allocation3], 4294965248 }
  0x6b   :  { %1220 = dma.done.wait [#allocation6], 32  }
  0x6c   :  { %1221 = vsyncadd [#allocation6], 4294967264 }
  0x6d   :  { %1222 = dma.done.wait [#allocation9], 10240  }
  0x6e   :  { %1223 = vsyncadd [#allocation9], 4294957056 }
  0x6f   :  { %1224 = dma.done.wait [#allocation12], 16  }
  0x70   :  { %1225 = vsyncadd [#allocation12], 4294967280  ;;  %v1238_v0 = vmov 0.0|0.0   ;;  %vm1239_vm0 = vmmov 0   ;;  %v1240_v1 = vmov 0.0   ;;  %v116_v2 = vld [vmem:[%s1449_s1] sm:$0xff]  ;;  %v337_v41 = vlaneseq }
  0x71   :  { %913 = vmatprep.subr.bf16.mxu1 %v1238_v0  ;;  %835 = vmatprep.mubr.msk.f32.mxu1 %vm1239_vm0, %v1240_v1  ;;  %v117_v3 = vld [vmem:[%s1449_s1 + $0x8] sm:$0xff]  ;;  %v199_v5 = vld [vmem:[#allocation2] sm:$0xff]  ;;  %v200_v6 = vld [vmem:[#allocation2 + $0x8] sm:$0xff]  ;;  %vm125_vm1 = vcmask 130048   ;;  %vm347_vm3 = vcmask 64512  }
  0x72   :  { %873 = vmatprep.subr.mxu0 %v1240_v1  ;;  %875 = vmatprep.mubr.msk.f32.mxu0 %vm1239_vm0, %v1240_v1  ;;  %v914_v4 = vpack.c.bf16 %v117_v3, %v116_v2  ;;  %v115_v7 = vld [vmem:[%s1448_s0] sm:$0xff]  ;;  %v917_v8 = vpack.c.bf16 %v200_v6, %v199_v5  ;;  %v202_v10 = vld [vmem:[#allocation2 + $0x18] sm:$0xff]  ;;  %v203_v12 = vld [vmem:[#allocation2 + $0x20] sm:$0xff]  ;;  %v338_v42 = vshrl.u32 %v337_v41, 7 }
  0x73   :  { %v201_v9 = vld [vmem:[#allocation2 + $0x10] sm:$0xff]  ;;  %v204_v13 = vld [vmem:[#allocation2 + $0x28] sm:$0xff]  ;;  %v206_v16 = vld [vmem:[#allocation2 + $0x38] sm:$0xff] }
  0x74   :  { %915 = vmatpush3.bf16.msra.mxu1 %v914_v4  ;;  %v920_v11 = vpack.c.bf16 %v202_v10, %v201_v9  ;;  %v923_v14 = vpack.c.bf16 %v204_v13, %v203_v12  ;;  %v205_v15 = vld [vmem:[#allocation2 + $0x30] sm:$0xff]  ;;  %v207_v18 = vld [vmem:[#allocation2 + $0x40] sm:$0xff]  ;;  %v208_v19 = vld [vmem:[#allocation2 + $0x48] sm:$0xff]  ;;  %v339_v43 = vsub.s32 0, %v338_v42 }
  0x75   :  { %916 = vmatprep.subr.bf16.mxu1 %v1238_v0  ;;  %v926_v17 = vpack.c.bf16 %v206_v16, %v205_v15  ;;  %v929_v20 = vpack.c.bf16 %v208_v19, %v207_v18  ;;  %v209_v21 = vld [vmem:[#allocation2 + $0x50] sm:$0xff]  ;;  %v210_v22 = vld [vmem:[#allocation2 + $0x58] sm:$0xff]  ;;  %v211_v24 = vld [vmem:[#allocation2 + $0x60] sm:$0xff] }
  0x76   :  { %v932_v23 = vpack.c.bf16 %v210_v22, %v209_v21  ;;  %v212_v25 = vld [vmem:[#allocation2 + $0x68] sm:$0xff]  ;;  %v213_v27 = vld [vmem:[#allocation2 + $0x70] sm:$0xff]  ;;  %v214_v28 = vld [vmem:[#allocation2 + $0x78] sm:$0xff] }
  0x77   :  { %836 = vmatmul.mubr.msk.f32.vlgmr.msra.gmra.mrb[0].mxu1 %vm125_vm1, %v115_v7  ;;  %v935_v26 = vpack.c.bf16 %v212_v25, %v211_v24  ;;  %v938_v29 = vpack.c.bf16 %v214_v28, %v213_v27  ;;  %v783_v30 = vld [vmem:[%s1450_s2] ss:$0 sm:$0xff]  ;;  %v786_v38 = vld [vmem:[#allocation5] ss:$0 sm:$0xff]  ;;  %v442_v2 = vld [vmem:[#allocation8 + $0x10] sm:$0xff] }
  0x78   :  { %918 = vmatpush3.bf16.msra.mxu1 %v917_v8  ;;  %870 = vmatprep.mubr.msk.f32.mxu1 %vm1239_vm0, %v1240_v1  ;;  %v785_v34 = vld [vmem:[%s1452_s4] ss:$0 sm:$0xff]  ;;  %v443_v60 = vld [vmem:[#allocation8 + $0x18] sm:$0xff]  ;;  %v446_v3 = vld [vmem:[#allocation8 + $0x30] sm:$0xff] }
  0x79   :  { %919 = vmatprep.subr.bf16.mxu1 %v1238_v0  ;;  %v345_v49 = vld [vmem:[%s1455_s7] sm:$0xff]  ;;  %v447_v62 = vld [vmem:[#allocation8 + $0x38] sm:$0xff]  ;;  %v974_v4 = vpack.c.bf16 %v446_v3, %v442_v2  ;;  %v480_v2 = vld [vmem:[#allocation8 + $0x140] sm:$0xff]  ;;  %s1241_s7 = smov [#allocation13]  }
  0x7a   :  { %v441_v58 = vld [vmem:[#allocation8 + $0x8] sm:$0xff]  ;;  %v972_v63 = vpack.c.bf16 %v447_v62, %v443_v60  ;;  %v451_v5 = vld [vmem:[#allocation8 + $0x58] sm:$0xff]  ;;  %v450_v8 = vld [vmem:[#allocation8 + $0x50] sm:$0xff]  ;;  %s771_s22 = sshll.u32 %s1241_s7, 4  ;;  %s772_s22 = int_to_ptr.vmem [resolvable:$true] %s771_s22 }
  0x7b   :  { %v445_v59 = vld [vmem:[#allocation8 + $0x28] sm:$0xff]  ;;  %v455_v6 = vld [vmem:[#allocation8 + $0x78] sm:$0xff]  ;;  %v454_v9 = vld [vmem:[#allocation8 + $0x70] sm:$0xff]  ;;  %s1196_s18 = scalar_lea.vmem %s772_s22, 128  ;;  %p1201_p7 = scmp.lt.s32.totalorder %s772_s22, %s772_s22 }
  0x7c   :  { %921 = vmatpush3.bf16.msra.mxu1 %v920_v11  ;;  %v940_v61 = vpack.c.bf16 %v445_v59, %v441_v58  ;;  %v976_v7 = vpack.c.bf16 %v455_v6, %v451_v5  ;;  %v978_v10 = vpack.c.bf16 %v454_v9, %v450_v8  ;;  %v459_v11 = vld [vmem:[#allocation8 + $0x98] sm:$0xff]  ;;  %v462_v15 = vld [vmem:[#allocation8 + $0xb0] sm:$0xff]  ;;  %v461_v41 = vld [vmem:[#allocation8 + $0xa8] sm:$0xff]  ;;  %p1197_p6 = scmp.ne.s32.totalorder %s772_s22, %s1196_s18  ;;  %p1202_p8 = scmp.lt.s32.totalorder %s1196_s18, %s1196_s18 }
  0x7d   :  { %922 = vmatprep.subr.bf16.mxu1 %v1238_v0  ;;  %v463_v12 = vld [vmem:[#allocation8 + $0xb8] sm:$0xff]  ;;  %v470_v21 = vld [vmem:[#allocation8 + $0xf0] sm:$0xff]  ;;  %v481_v59 = vld [vmem:[#allocation8 + $0x148] sm:$0xff] }
  0x7e   :  { %v980_v13 = vpack.c.bf16 %v463_v12, %v459_v11  ;;  %v471_v18 = vld [vmem:[#allocation8 + $0xf8] sm:$0xff]  ;;  %v478_v27 = vld [vmem:[#allocation8 + $0x130] sm:$0xff]  ;;  %v485_v60 = vld [vmem:[#allocation8 + $0x168] sm:$0xff]  ;;  %p1203_p9 = por %p1202_p8, %p1201_p7 }
  0x7f   :  { %v479_v24 = vld [vmem:[#allocation8 + $0x138] sm:$0xff]  ;;  %v960_v62 = vpack.c.bf16 %v485_v60, %v481_v59  ;;  %v484_v3 = vld [vmem:[#allocation8 + $0x160] sm:$0xff]  ;;  %v482_v6 = vld [vmem:[#allocation8 + $0x150] sm:$0xff] }
  0x80   :  { %924 = vmatpush3.bf16.msra.mxu1 %v923_v14  ;;  %v458_v14 = vld [vmem:[#allocation8 + $0x90] sm:$0xff]  ;;  %v962_v5 = vpack.c.bf16 %v484_v3, %v480_v2  ;;  %v489_v9 = vld [vmem:[#allocation8 + $0x188] sm:$0xff]  ;;  %v491_v11 = vld [vmem:[#allocation8 + $0x198] sm:$0xff]  ;;  %p1204_p10 = pnand %p1203_p9, %p1197_p6 }
  0x81   :  { %925 = vmatprep.subr.bf16.mxu1 %v1238_v0  ;;  %v982_v16 = vpack.c.bf16 %v462_v15, %v458_v14  ;;  %v488_v14 = vld [vmem:[#allocation8 + $0x180] sm:$0xff]  ;;  %v676_v59 = vld [vmem:[#allocation10 + $0x78] sm:$0xff] }
  0x82   :  { %v492_v15 = vld [vmem:[#allocation8 + $0x1a0] sm:$0xff] }
  0x84   :  { %927 = vmatpush3.bf16.msra.mxu1 %v926_v17  ;;  %v467_v17 = vld [vmem:[#allocation8 + $0xd8] sm:$0xff] }
  0x85   :  { %928 = vmatprep.subr.bf16.mxu1 %v1238_v0  ;;  %v984_v19 = vpack.c.bf16 %v471_v18, %v467_v17  ;;  %v966_v17 = vpack.c.bf16 %v492_v15, %v488_v14  ;;  %v490_v18 = vld [vmem:[#allocation8 + $0x190] sm:$0xff]  ;;  %v791_v14 = vld [vmem:[#allocation11] ss:$0 sm:$0xff] }
  0x88   :  { %930 = vmatpush3.bf16.msra.mxu1 %v929_v20  ;;  %v466_v20 = vld [vmem:[#allocation8 + $0xd0] sm:$0xff] }
  0x89   :  { %931 = vmatprep.subr.bf16.mxu1 %v1238_v0  ;;  %v986_v22 = vpack.c.bf16 %v470_v21, %v466_v20  ;;  %v497_v20 = vld [vmem:[#allocation8 + $0x1c8] sm:$0xff] }
  0x8c   :  { %933 = vmatpush3.bf16.msra.mxu1 %v932_v23  ;;  %v475_v23 = vld [vmem:[#allocation8 + $0x118] sm:$0xff] }
  0x8d   :  { %934 = vmatprep.subr.bf16.mxu1 %v1238_v0  ;;  %v988_v25 = vpack.c.bf16 %v479_v24, %v475_v23  ;;  %v499_v23 = vld [vmem:[#allocation8 + $0x1d8] sm:$0xff] }
  0x8e   :  { %v503_v24 = vld [vmem:[#allocation8 + $0x1f8] sm:$0xff] }
  0x90   :  { %936 = vmatpush3.bf16.msra.mxu1 %v935_v26  ;;  %v474_v26 = vld [vmem:[#allocation8 + $0x110] sm:$0xff] }
  0x91   :  { %937 = vmatprep.subr.bf16.mxu1 %v1238_v0  ;;  %v990_v28 = vpack.c.bf16 %v478_v27, %v474_v26  ;;  %v1000_v26 = vpack.c.bf16 %v503_v24, %v499_v23  ;;  %v496_v27 = vld [vmem:[#allocation8 + $0x1c0] sm:$0xff] }
  0x94   :  { %939 = vmatpush3.bf16.msra.mxu1 %v938_v29 }
  0x95   :  { %973 = vmatprep.subr.bf16.mxu1 %v972_v63  ;;  %v487_v63 = vld [vmem:[#allocation8 + $0x178] sm:$0xff] }
 0x14a   :  { %v195_v31 = vpop.f32.mrb[0].mxu1 }
 0x14b   :  { %v196_v32 = vadd.f32 %v783_v30, %v195_v31  ;;  %v837_v33 = vpop.f32.mrb[1].mxu1  ;;  %v440_v30 = vld [vmem:[#allocation8] sm:$0xff] }
 0x14c   :  { %v444_v31 = vld [vmem:[#allocation8 + $0x20] sm:$0xff]  ;;  %v453_v33 = vld [vmem:[#allocation8 + $0x68] sm:$0xff] }
 0x14d   :  { %871 = vmatmul.mubr.f32.vlgmr.msra.gmra.mrb[2].mxu1 %v196_v32  ;;  %v449_v32 = vld [vmem:[#allocation8 + $0x48] sm:$0xff] }
 0x14e   :  { %638 = vmatprep.mubr.f32.mxu1 %v1240_v1  ;;  %975 = vmatpush1.bf16.msra.mxu1 %v974_v4 }
 0x14f   :  { %977 = vmatprep.subr.bf16.mxu1 %v976_v7  ;;  %v486_v7 = vld [vmem:[#allocation8 + $0x170] sm:$0xff] }
 0x150   :  { %v994_v8 = vpack.c.bf16 %v486_v7, %v482_v6 }
 0x152   :  { %979 = vmatpush1.bf16.msra.mxu1 %v978_v10  ;;  %v493_v10 = vld [vmem:[#allocation8 + $0x1a8] sm:$0xff] }
 0x153   :  { %981 = vmatprep.subr.bf16.mxu1 %v980_v13  ;;  %v964_v12 = vpack.c.bf16 %v493_v10, %v489_v9  ;;  %v495_v13 = vld [vmem:[#allocation8 + $0x1b8] sm:$0xff] }
 0x156   :  { %983 = vmatpush1.bf16.msra.mxu1 %v982_v16  ;;  %v996_v16 = vpack.c.bf16 %v495_v13, %v491_v11 }
 0x157   :  { %985 = vmatprep.subr.bf16.mxu1 %v984_v19  ;;  %v494_v19 = vld [vmem:[#allocation8 + $0x1b0] sm:$0xff] }
 0x158   :  { %v998_v21 = vpack.c.bf16 %v494_v19, %v490_v18 }
 0x15a   :  { %987 = vmatpush1.bf16.msra.mxu1 %v986_v22  ;;  %v501_v22 = vld [vmem:[#allocation8 + $0x1e8] sm:$0xff] }
 0x15b   :  { %989 = vmatprep.subr.bf16.mxu1 %v988_v25  ;;  %v968_v25 = vpack.c.bf16 %v501_v22, %v497_v20 }
 0x15e   :  { %991 = vmatpush1.bf16.msra.mxu1 %v990_v28  ;;  %v500_v28 = vld [vmem:[#allocation8 + $0x1e0] sm:$0xff] }
 0x220   :  { %v281_v35 = vpop.f32.mrb[2].mxu1 }
 0x221   :  { %v872_v36 = vpop.f32.mrb[3].mxu1  ;;  %874 = vmatpush3.msra.mxu0 %v281_v35  ;;  %v292_v37 = vmul.f32 %v785_v34, %v281_v35  ;;  %v302_v39 = vmul.f32 %v786_v38, %v281_v35  ;;  %v942_v35 = vpack.c.bf16 %v444_v31, %v440_v30  ;;  %v448_v38 = vld [vmem:[#allocation8 + $0x40] sm:$0xff]  ;;  %v970_v30 = vpack.c.bf16 %v500_v28, %v496_v27  ;;  %v502_v31 = vld [vmem:[#allocation8 + $0x1f0] sm:$0xff] }
 0x222   :  { %941 = vmatprep.subr.bf16.mxu0 %v940_v61  ;;  %v483_v61 = vld [vmem:[#allocation8 + $0x158] sm:$0xff] }
 0x223   :  { %293 = vadd.xlane.f32.xlu0 %v292_v37  ;;  %v944_v37 = vpack.c.bf16 %v453_v33, %v449_v32  ;;  %v992_v4 = vpack.c.bf16 %v487_v63, %v483_v61  ;;  %v787_v33 = vld [vmem:[#allocation7] ss:$0 sm:$0xff] }
 0x225   :  { %993 = vmatprep.subr.bf16.mxu1 %v992_v4 }
 0x226   :  { %995 = vmatpush1.bf16.msra.mxu1 %v994_v8 }
 0x227   :  { %303 = vadd.xlane.f32.xlu0 %v302_v39  ;;  %v452_v39 = vld [vmem:[#allocation8 + $0x60] sm:$0xff]  ;;  %997 = vmatprep.subr.bf16.mxu1 %v996_v16 }
 0x228   :  { %v946_v42 = vpack.c.bf16 %v452_v39, %v448_v38  ;;  %v661_v38 = vld [vmem:[#allocation10] sm:$0xff]  ;;  %v662_v39 = vld [vmem:[#allocation10 + $0x8] sm:$0xff] }
 0x22a   :  { %999 = vmatpush1.bf16.msra.mxu1 %v998_v21 }
 0x22b   :  { %1001 = vmatprep.subr.bf16.mxu1 %v1000_v26 }
 0x2b0   :  { %v294_v40 = vpop.xlane.xlu0 %293 }
 0x2b1   :  { %305 = vxpose.xlu1.b32.start.end [1/1] (short) (narrow) %v294_v40, 8  ;;  %v457_v40 = vld [vmem:[#allocation8 + $0x88] sm:$0xff] }
 0x2b4   :  { %v304_v46 = vpop.xlane.xlu0 %303 }
 0x331   :  { %v321_v44 = vpop.trf.xlu1 }
 0x332   :  { %v340_v45 = vrot.slane %v321_v44, %v339_v43  ;;  %v948_v43 = vpack.c.bf16 %v461_v41, %v457_v40  ;;  %v456_v44 = vld [vmem:[#allocation8 + $0x80] sm:$0xff]  ;;  %v1005_v40 = vpack.c.bf16 %v662_v39, %v661_v38  ;;  %v663_v41 = vld [vmem:[#allocation10 + $0x10] sm:$0xff] }
 0x334   :  { %v341_v47 = vadd.f32 %v340_v45, %v304_v46  ;;  %v460_v45 = vld [vmem:[#allocation8 + $0xa0] sm:$0xff]  ;;  %v465_v46 = vld [vmem:[#allocation8 + $0xc8] sm:$0xff] }
 0x336   :  { %v343_v48 = vmul.f32 0.2, %v341_v47  ;;  %vm342_vm2 = vcmp.gt.f32.partialorder %v341_v47, 0.0 }
 0x338   :  { %v344_v50 = vsel %vm342_vm2, %v341_v47, %v343_v48  ;;  %v469_v47 = vld [vmem:[#allocation8 + $0xe8] sm:$0xff]  ;;  %v950_v48 = vpack.c.bf16 %v460_v45, %v456_v44  ;;  %v665_v44 = vld [vmem:[#allocation10 + $0x20] sm:$0xff] }
 0x339   :  { %v346_v51 = vadd.f32 %v345_v49, %v344_v50  ;;  %v952_v49 = vpack.c.bf16 %v469_v47, %v465_v46  ;;  %v464_v50 = vld [vmem:[#allocation8 + $0xc0] sm:$0xff]  ;;  %v666_v45 = vld [vmem:[#allocation10 + $0x28] sm:$0xff]  ;;  %v667_v47 = vld [vmem:[#allocation10 + $0x30] sm:$0xff] }
 0x33a   :  { %v1011_v46 = vpack.c.bf16 %v666_v45, %v665_v44 }
 0x33b   :  { %v348_v52 = vsel %vm347_vm3, %v346_v51, -inf }
 0x33c   :  { %349 = vmax.xlane.f32.xlu1 %v348_v52  ;;  %v473_v52 = vld [vmem:[#allocation8 + $0x108] sm:$0xff] }
 0x3c9   :  { %v350_v53 = vpop.xlane.xlu1 %349 }
 0x3ca   :  { %v351_v54 = vsub.f32 %v346_v51, %v350_v53  ;;  %v468_v51 = vld [vmem:[#allocation8 + $0xe0] sm:$0xff]  ;;  %v477_v53 = vld [vmem:[#allocation8 + $0x128] sm:$0xff] }
 0x3cc   :  { %v352_v55 = vmul.f32 1.442695, %v351_v54  ;;  %v954_v54 = vpack.c.bf16 %v468_v51, %v464_v50  ;;  %v670_v50 = vld [vmem:[#allocation10 + $0x48] sm:$0xff] }
 0x3ce   :  { %1042 = vpow2.f32 %v352_v55  ;;  %v956_v55 = vpack.c.bf16 %v477_v53, %v473_v52  ;;  %v671_v52 = vld [vmem:[#allocation10 + $0x50] sm:$0xff]  ;;  %v672_v53 = vld [vmem:[#allocation10 + $0x58] sm:$0xff] }
 0x3d8   :  { %v1043_v56 = vpop.eup %1042 }
 0x3d9   :  { %v354_v57 = vsel %vm347_vm3, %v1043_v56, 0.0 }
 0x3da   :  { %355 = vadd.xlane.f32.xlu0 %v354_v57  ;;  %v476_v57 = vld [vmem:[#allocation8 + $0x120] sm:$0xff] }
 0x467   :  { %v356_v29 = vpop.xlane.xlu0 %355 }
 0x468   :  { %1044 = vrcp.f32 %v356_v29  ;;  %v498_v29 = vld [vmem:[#allocation8 + $0x1d0] sm:$0xff] }
 0x469   :  { %v1002_v32 = vpack.c.bf16 %v502_v31, %v498_v29 }
 0x46b   :  { %1003 = vmatpush1.bf16.msra.mxu1 %v1002_v32 }
 0x472   :  { %v1045_v34 = vpop.eup %1044 }
 0x473   :  { %v358_v36 = vmul.f32 %v1045_v34, %v1043_v56  ;;  %v472_v56 = vld [vmem:[#allocation8 + $0x100] sm:$0xff] }
 0x474   :  { %v958_v58 = vpack.c.bf16 %v476_v57, %v472_v56  ;;  %v674_v56 = vld [vmem:[#allocation10 + $0x68] sm:$0xff] }
 0x475   :  { %876 = vmatmul.mubr.msk.f32.vlgmr.msra.gmra.mrb[0].mxu0 %vm347_vm3, %v358_v36 }
 0x476   :  { %943 = vmatpush1.bf16.msra.mxu0 %v942_v35  ;;  %568 = vmatprep.mubr.f32.mxu0 %v1240_v1 }
 0x477   :  { %945 = vmatprep.subr.bf16.mxu0 %v944_v37 }
 0x47a   :  { %947 = vmatpush1.bf16.msra.mxu0 %v946_v42  ;;  %v664_v42 = vld [vmem:[#allocation10 + $0x18] sm:$0xff] }
 0x47b   :  { %949 = vmatprep.subr.bf16.mxu0 %v948_v43  ;;  %v1008_v43 = vpack.c.bf16 %v664_v42, %v663_v41 }
 0x47e   :  { %951 = vmatpush1.bf16.msra.mxu0 %v950_v48 }
 0x47f   :  { %953 = vmatprep.subr.bf16.mxu0 %v952_v49  ;;  %v669_v49 = vld [vmem:[#allocation10 + $0x40] sm:$0xff] }
 0x480   :  { %v1017_v51 = vpack.c.bf16 %v670_v50, %v669_v49 }
 0x482   :  { %955 = vmatpush1.bf16.msra.mxu0 %v954_v54  ;;  %v1020_v54 = vpack.c.bf16 %v672_v53, %v671_v52 }
 0x483   :  { %957 = vmatprep.subr.bf16.mxu0 %v956_v55  ;;  %v673_v55 = vld [vmem:[#allocation10 + $0x60] sm:$0xff] }
 0x484   :  { %v1023_v57 = vpack.c.bf16 %v674_v56, %v673_v55 }
 0x486   :  { %959 = vmatpush1.bf16.msra.mxu0 %v958_v58  ;;  %v675_v58 = vld [vmem:[#allocation10 + $0x70] sm:$0xff] }
 0x487   :  { %961 = vmatprep.subr.bf16.mxu0 %v960_v62  ;;  %v1026_v60 = vpack.c.bf16 %v676_v59, %v675_v58 }
 0x48a   :  { %963 = vmatpush1.bf16.msra.mxu0 %v962_v5 }
 0x48b   :  { %965 = vmatprep.subr.bf16.mxu0 %v964_v12 }
 0x48e   :  { %967 = vmatpush1.bf16.msra.mxu0 %v966_v17 }
 0x48f   :  { %969 = vmatprep.subr.bf16.mxu0 %v968_v25 }
 0x492   :  { %971 = vmatpush1.bf16.msra.mxu0 %v970_v30 }
 0x493   :  { %1004 = vmatprep.subr.bf16.mxu0 %v1238_v0 }
 0x548   :  { %v435_v34 = vpop.f32.mrb[0].mxu0 }
 0x549   :  { %v436_v35 = vadd.f32 %v787_v33, %v435_v34  ;;  %v877_v36 = vpop.f32.mrb[1].mxu0 }
 0x54b   :  { %1046 = vtanh.f32 %v436_v35 }
 0x555   :  { %v1047_v37 = vpop.eup %1046 }
 0x556   :  { %569 = vmatmul.mubr.f32.vlgmr.msra.gmra.mrb[2].mxu0 %v1047_v37  ;;  %639 = vmatmul.mubr.f32.vlgmr.msra.gmra.mrb[4].mxu1 %v1047_v37 }
 0x557   :  { %910 = vmatprep.mubr.msk.f32.mxu0 %vm1239_vm0, %v1240_v1  ;;  %1006 = vmatpush3.bf16.msra.mxu0 %v1005_v40  ;;  %v668_v1 = vld [vmem:[#allocation10 + $0x38] sm:$0xff] }
 0x558   :  { %1007 = vmatprep.subr.bf16.mxu0 %v1238_v0  ;;  %v1014_v48 = vpack.c.bf16 %v668_v1, %v667_v47 }
 0x55b   :  { %1009 = vmatpush3.bf16.msra.mxu0 %v1008_v43 }
 0x55c   :  { %1010 = vmatprep.subr.bf16.mxu0 %v1238_v0 }
 0x55f   :  { %1012 = vmatpush3.bf16.msra.mxu0 %v1011_v46 }
 0x560   :  { %1013 = vmatprep.subr.bf16.mxu0 %v1238_v0 }
 0x563   :  { %1015 = vmatpush3.bf16.msra.mxu0 %v1014_v48 }
 0x564   :  { %1016 = vmatprep.subr.bf16.mxu0 %v1238_v0 }
 0x567   :  { %1018 = vmatpush3.bf16.msra.mxu0 %v1017_v51 }
 0x568   :  { %1019 = vmatprep.subr.bf16.mxu0 %v1238_v0 }
 0x56b   :  { %1021 = vmatpush3.bf16.msra.mxu0 %v1020_v54 }
 0x56c   :  { %1022 = vmatprep.subr.bf16.mxu0 %v1238_v0 }
 0x56f   :  { %1024 = vmatpush3.bf16.msra.mxu0 %v1023_v57 }
 0x570   :  { %1025 = vmatprep.subr.bf16.mxu0 %v1238_v0 }
 0x573   :  { %1027 = vmatpush3.bf16.msra.mxu0 %v1026_v60 }
 0x629   :  { %v570_v61 = vpop.f32.mrb[2].mxu0  ;;  %v640_v62 = vpop.f32.mrb[4].mxu1 }
 0x62a   :  { %v789_v63 = vmul.f32 -1.442695, %v570_v61  ;;  %v572_v2 = vpop.f32.mrb[3].mxu0  ;;  %v642_v3 = vpop.f32.mrb[5].mxu1 }
 0x62b   :  { %v790_v4 = vmul.f32 -1.442695, %v642_v3 }
 0x62c   :  { %1048 = vpow2.f32 %v789_v63 }
 0x62d   :  { %1050 = vpow2.f32 %v790_v4 }
 0x62e   :  { %1052 = vtanh.f32 %v640_v62 }
 0x636   :  { %v1049_v5 = vpop.eup %1048 }
 0x637   :  { %v648_v6 = vadd.f32 1.0, %v1049_v5  ;;  %v1051_v7 = vpop.eup %1050 }
 0x638   :  { %v655_v8 = vadd.f32 1.0, %v1051_v7  ;;  %v1053_v9 = vpop.eup %1052 }
 0x639   :  { %1054 = vrcp.f32 %v648_v6 }
 0x63a   :  { %1056 = vrcp.f32 %v655_v8 }
 0x643   :  { %v1055_v10 = vpop.eup %1054 }
 0x644   :  { %v658_v11 = vmul.f32 %v1055_v10, %v1053_v9  ;;  %v1057_v0 = vpop.eup %1056 }
 0x646   :  { %1058 = vtanh.f32 %v658_v11 }
 0x650   :  { %v1059_v12 = vpop.eup %1058 }
 0x651   :  { %v660_v13 = vmul.f32 %v1059_v12, %v1057_v0 }
 0x653   :  { %911 = vmatmul.mubr.f32.vlgmr.msra.gmra.mrb[4].mxu0 %v660_v13 }
 0x726   :  { %v750_v15 = vpop.f32.mrb[4].mxu0 }
 0x727   :  { %v751_v16 = vadd.f32 %v791_v14, %v750_v15  ;;  %v912_v17 = vpop.f32.mrb[5].mxu0 }
 0x729   :  { %754 = vmax.xlane.f32.xlu0 %v751_v16 }
 0x7b6   :  { %v755_v18 = vpop.xlane.xlu0 %754 }
 0x7b7   :  { %v756_v19 = vsub.f32 %v751_v16, %v755_v18 }
 0x7b9   :  { %v757_v20 = vmul.f32 1.442695, %v756_v19 }
 0x7bb   :  { %1060 = vpow2.f32 %v757_v20 }
 0x7c5   :  { %v1061_v21 = vpop.eup %1060 }
 0x7c6   :  { %759 = vadd.xlane.f32.xlu0 %v1061_v21 }
 0x853   :  { %v760_v22 = vpop.xlane.xlu0 %759 }
 0x854   :  { %1062 = vlog2.f32 %v760_v22 }
 0x85e   :  { %v1063_v23 = vpop.eup %1062 }
 0x85f   :  { %v762_v24 = vmul.f32 0.6931472, %v1063_v23 }
 0x861   :  { %v763_v25 = vsub.f32 %v756_v19, %v762_v24 }
 0x863   :  { %764 = vst [vmem:[#allocation13] sm:$0xff] %v763_v25 }
 0x864   :  { %1207 = shalt.err (!%p1204_p10)
}
 0x865   :  { %s1208_s23 = scalar_lea.hbm %s1459_s11, 128 }
 0x866   :  { %p1209_p11 = scmp.ne.s32.totalorder %s1459_s11, %s1208_s23  ;;  %p1212_p12 = scmp.lt.u32.totalorder %s1208_s23, %s1459_s11 }
 0x868   :  { %p1214_p13 = pnand %p1212_p12, %p1209_p11 }
 0x86a   :  { %1217 = shalt.err (!%p1214_p13)
}
 0x86b   :  { %774 = dma.vmem_to_hbm [thread:$0]  %s772_s22, 128, %s1459_s11, [#allocation4]  }
 0x86c   :  { %1226 = dma.done.wait [#allocation4], 128  }
 0x86d   :  { %1227 = vsyncadd [#allocation4], 4294967168 }
 0x86e   :  { %778 = vsyncpa [#allocation3], 1 }
 0x86f   :  { %779 = vsyncpa [#allocation6], 1 }
 0x870   :  { %780 = vsyncpa [#allocation9], 1 }
 0x871   :  { %781 = vsyncpa [#allocation12], 1 }
 0x872   :  { %782 = vsyncpa [#allocation4], 1 }

</bundles_post_ra>
